<compile_context>
chip_gen: v6e
topology: v6e:2x2x1
jax: 0.10.0
libtpu: 0.0.40
codegen_flags: <defaults>
</compile_context>

<pallas_src>
import functools

import jax
import jax.numpy as jnp
from jax import lax
from jax.experimental import pallas as pl
from jax.experimental.pallas import tpu as pltpu


def _multiloss_kernel(p_ref, l_ref, pt_ref, lt_ref, out_ref, *, C, H, W, w_tex):
    # One batch element per grid step.
    p = p_ref[0].astype(jnp.float32)          # preds   (C, H, W)
    l = l_ref[0].astype(jnp.float32)          # labels  (C, H, W)
    d = p - l

    # Laplacian conv (kernel [[0,1,0],[1,-4,1],[0,1,0]], zero padding, shared
    # across the 3 input channels -> 1 output channel), applied to the
    # *difference* (linearity), with the channel sum hoisted in front of the
    # spatial taps.  Lane/sublane shifts via pltpu.roll + boundary masks.
    s = jnp.sum(d, axis=0)                    # (H, W)
    row = lax.broadcasted_iota(jnp.int32, (H, W), 0)
    col = lax.broadcasted_iota(jnp.int32, (H, W), 1)
    left  = jnp.where(col == 0,     0.0, pltpu.roll(s, 1,     axis=1))  # s[y, x-1]
    right = jnp.where(col == W - 1, 0.0, pltpu.roll(s, W - 1, axis=1))  # s[y, x+1]
    up    = jnp.where(row == 0,     0.0, pltpu.roll(s, 1,     axis=0))  # s[y-1, x]
    down  = jnp.where(row == H - 1, 0.0, pltpu.roll(s, H - 1, axis=0))  # s[y+1, x]
    lap = up + down + left + right - 4.0 * s  # conv output (1 channel), (H, W)

    g = d - lap[None, :, :]                   # gradient-loss residual, bcast over C

    # Fused per-element accumulator for every term sharing the B*C*H*W mean:
    #   |preds - labels| + 0.01*|g| + 0.001*(1 - labels)
    elem = jnp.abs(d) + 0.01 * jnp.abs(g) + 0.001 * (1.0 - l)

    pt = pt_ref[0].astype(jnp.float32)        # (1, C*H*W) lane-dense texture view
    lt = lt_ref[0].astype(jnp.float32)

    partial = jnp.sum(elem) + w_tex * jnp.sum(jnp.abs(pt - lt))

    # Splat the per-sample partial into one full (8,128) tile (unmasked store);
    # the wrapper reads [:, 0, 0] and finishes the mean.
    out_ref[...] = jnp.broadcast_to(partial, out_ref.shape)


def multiloss_pallas(preds_cartoon, preds_texture, preds, labels_texture, labels):
    """Forward of `multiloss`. `preds_cartoon` is unused (as in the PyTorch code)."""
    del preds_cartoon
    B, C, H, W = preds.shape
    assert C == 3, "Laplacian conv weight has in_channels=3"
    assert labels.shape == preds.shape
    assert preds_texture.shape == labels_texture.shape
    assert preds_texture.shape[0] == B

    n = B * C * H * W                 # mean normalizer shared by the hybrid terms
    n_tex = preds_texture.size        # L1Loss(texture) normalizer
    # Fold the 0.001 texture weight and its own mean normalizer so a single /n
    # at the end is exact.
    w_tex = 0.001 * float(n) / float(n_tex)

    # Lane-dense view of the texture pair (elementwise L1 only).
    kt = n_tex // B
    pt_flat = preds_texture.reshape(B, 1, kt)
    lt_flat = labels_texture.reshape(B, 1, kt)

    kernel = functools.partial(_multiloss_kernel, C=C, H=H, W=W, w_tex=w_tex)
    spatial_spec = pl.BlockSpec((1, C, H, W), lambda b: (b, 0, 0, 0))
    tex_spec = pl.BlockSpec((1, 1, kt), lambda b: (b, 0, 0))

    partials = pl.pallas_call(
        kernel,
        out_shape=jax.ShapeDtypeStruct((B, 8, 128), jnp.float32),
        grid=(B,),
        in_specs=[spatial_spec, spatial_spec, tex_spec, tex_spec],
        out_specs=pl.BlockSpec((1, 8, 128), lambda b: (b, 0, 0)),
        compiler_params=pltpu.CompilerParams(
            # Independent per-sample partials: lets v7x shard the grid over both
            # TensorCores; measured-neutral on v5e/v6e (single TC).
            dimension_semantics=("parallel",),
        ),
    )(preds, labels, pt_flat, lt_flat)

    return jnp.sum(partials[:, 0, 0]) / n


def _multiloss_reference(preds_texture, preds, labels_texture, labels):
    """Pure-JAX transcription of the PyTorch module (sanity check only)."""
    def laplace(x):
        H, W = x.shape[2], x.shape[3]
        xp = jnp.pad(x, ((0, 0), (0, 0), (1, 1), (1, 1)))
        conv = jnp.sum(xp[:, :, 0:H, 1:W + 1] + xp[:, :, 2:H + 2, 1:W + 1]
                       + xp[:, :, 1:H + 1, 0:W] + xp[:, :, 1:H + 1, 2:W + 2]
                       - 4.0 * xp[:, :, 1:H + 1, 1:W + 1],
                       axis=1, keepdims=True)
        return x - conv

    g_loss = jnp.mean(jnp.abs(laplace(preds) - laplace(labels)))
    adversarial = jnp.mean(1.0 - labels)
    image_loss = jnp.mean(jnp.abs(preds - labels))
    loss_texture = jnp.mean(jnp.abs(preds_texture - labels_texture))
    # The 0.0*MSE and 0*TVLoss terms of HybridLoss are exactly zero and omitted.
    return image_loss + 0.01 * g_loss + 0.001 * adversarial + 0.001 * loss_texture


if __name__ == "__main__":
    key = jax.random.PRNGKey(0)
    k1, k2, k3, k4, k5 = jax.random.split(key, 5)
    B, C, H, W = 2, 3, 16, 16
    preds_cartoon = jax.random.normal(k1, (B, C, H, W), jnp.float32)
    preds_texture = jax.random.normal(k2, (B, C, H, W), jnp.float32)
    preds = jax.random.normal(k3, (B, C, H, W), jnp.float32)
    labels_texture = jax.random.normal(k4, (B, C, H, W), jnp.float32)
    labels = jax.random.normal(k5, (B, C, H, W), jnp.float32)

    loss = multiloss_pallas(preds_cartoon, preds_texture, preds,
                            labels_texture, labels)
    loss = jax.block_until_ready(loss)

    ref = jax.block_until_ready(
        _multiloss_reference(preds_texture, preds, labels_texture, labels))
    assert jnp.allclose(loss, ref, rtol=1e-3, atol=1e-3), (loss, ref)

    print("KERNEL_OK")
</pallas_src>

<mosaic_0001>
module attributes {stable_mosaic.version = 11 : i64} {
  func.func @_multiloss_kernel(%arg0: i32, %arg1: memref<1x3x16x16xf32, #tpu.memory_space<vmem>>, %arg2: memref<1x3x16x16xf32, #tpu.memory_space<vmem>>, %arg3: memref<1x1x768xf32, #tpu.memory_space<vmem>>, %arg4: memref<1x1x768xf32, #tpu.memory_space<vmem>>, %arg5: memref<1x8x128xf32, #tpu.memory_space<vmem>>) attributes {dimension_semantics = [#tpu.dimension_semantics<parallel>], iteration_bounds = array<i64: 2>, scalar_prefetch = 0 : i64, scratch_operands = 0 : i64, tpu.core_type = #tpu.core_type<tc>, window_params = [{transform_indices = @transform_0, window_bounds = array<i64: 1, 3, 16, 16>}, {transform_indices = @transform_1, window_bounds = array<i64: 1, 3, 16, 16>}, {transform_indices = @transform_2, window_bounds = array<i64: 1, 1, 768>}, {transform_indices = @transform_3, window_bounds = array<i64: 1, 1, 768>}, {transform_indices = @transform_4, window_bounds = array<i64: 1, 8, 128>}]} {
    %c0 = arith.constant 0 : index
    %c0_0 = arith.constant 0 : index
    %c0_1 = arith.constant 0 : index
    %c0_2 = arith.constant 0 : index
    %0 = vector.load %arg1[%c0, %c0_0, %c0_1, %c0_2] : memref<1x3x16x16xf32, #tpu.memory_space<vmem>>, vector<1x3x16x16xf32>
    %1 = vector.shape_cast %0 : vector<1x3x16x16xf32> to vector<3x16x16xf32>
    %c0_3 = arith.constant 0 : index
    %c0_4 = arith.constant 0 : index
    %c0_5 = arith.constant 0 : index
    %c0_6 = arith.constant 0 : index
    %2 = vector.load %arg2[%c0_3, %c0_4, %c0_5, %c0_6] : memref<1x3x16x16xf32, #tpu.memory_space<vmem>>, vector<1x3x16x16xf32>
    %3 = vector.shape_cast %2 : vector<1x3x16x16xf32> to vector<3x16x16xf32>
    %4 = arith.subf %1, %3 : vector<3x16x16xf32>
    %cst = arith.constant dense<0.000000e+00> : vector<16x16xf32>
    %5 = vector.multi_reduction <add>, %4, %cst [0] : vector<3x16x16xf32> to vector<16x16xf32>
    %6 = tpu.iota {dimensions = array<i32: 0>} : vector<16x16xi32>
    %7 = tpu.iota {dimensions = array<i32: 1>} : vector<16x16xi32>
    %c0_i32 = arith.constant 0 : i32
    %8 = vector.broadcast %c0_i32 : i32 to vector<16x16xi32>
    %9 = arith.cmpi eq, %7, %8 : vector<16x16xi32>
    %c1_i32 = arith.constant 1 : i32
    %10 = tpu.dynamic_rotate %5 by %c1_i32 dim 1 : vector<16x16xf32>, i32 -> vector<16x16xf32>
    %cst_7 = arith.constant 0.000000e+00 : f32
    %11 = vector.broadcast %cst_7 : f32 to vector<16x16xf32>
    %12 = arith.select %9, %11, %10 : vector<16x16xi1>, vector<16x16xf32>
    %c15_i32 = arith.constant 15 : i32
    %13 = vector.broadcast %c15_i32 : i32 to vector<16x16xi32>
    %14 = arith.cmpi eq, %7, %13 : vector<16x16xi32>
    %c15_i32_8 = arith.constant 15 : i32
    %15 = tpu.dynamic_rotate %5 by %c15_i32_8 dim 1 : vector<16x16xf32>, i32 -> vector<16x16xf32>
    %cst_9 = arith.constant 0.000000e+00 : f32
    %16 = vector.broadcast %cst_9 : f32 to vector<16x16xf32>
    %17 = arith.select %14, %16, %15 : vector<16x16xi1>, vector<16x16xf32>
    %c0_i32_10 = arith.constant 0 : i32
    %18 = vector.broadcast %c0_i32_10 : i32 to vector<16x16xi32>
    %19 = arith.cmpi eq, %6, %18 : vector<16x16xi32>
    %c1_i32_11 = arith.constant 1 : i32
    %20 = tpu.dynamic_rotate %5 by %c1_i32_11 dim 0 : vector<16x16xf32>, i32 -> vector<16x16xf32>
    %cst_12 = arith.constant 0.000000e+00 : f32
    %21 = vector.broadcast %cst_12 : f32 to vector<16x16xf32>
    %22 = arith.select %19, %21, %20 : vector<16x16xi1>, vector<16x16xf32>
    %c15_i32_13 = arith.constant 15 : i32
    %23 = vector.broadcast %c15_i32_13 : i32 to vector<16x16xi32>
    %24 = arith.cmpi eq, %6, %23 : vector<16x16xi32>
    %c15_i32_14 = arith.constant 15 : i32
    %25 = tpu.dynamic_rotate %5 by %c15_i32_14 dim 0 : vector<16x16xf32>, i32 -> vector<16x16xf32>
    %cst_15 = arith.constant 0.000000e+00 : f32
    %26 = vector.broadcast %cst_15 : f32 to vector<16x16xf32>
    %27 = arith.select %24, %26, %25 : vector<16x16xi1>, vector<16x16xf32>
    %28 = arith.addf %22, %27 : vector<16x16xf32>
    %29 = arith.addf %28, %12 : vector<16x16xf32>
    %30 = arith.addf %29, %17 : vector<16x16xf32>
    %cst_16 = arith.constant 4.000000e+00 : f32
    %31 = vector.broadcast %cst_16 : f32 to vector<16x16xf32>
    %32 = arith.mulf %31, %5 : vector<16x16xf32>
    %33 = arith.subf %30, %32 : vector<16x16xf32>
    %34 = vector.shape_cast %33 : vector<16x16xf32> to vector<1x16x16xf32>
    %35 = vector.broadcast %34 : vector<1x16x16xf32> to vector<3x16x16xf32>
    %36 = arith.subf %4, %35 : vector<3x16x16xf32>
    %37 = math.absf %4 : vector<3x16x16xf32>
    %38 = math.absf %36 : vector<3x16x16xf32>
    %cst_17 = arith.constant 0.00999999977 : f32
    %39 = vector.broadcast %cst_17 : f32 to vector<3x16x16xf32>
    %40 = arith.mulf %39, %38 : vector<3x16x16xf32>
    %41 = arith.addf %37, %40 : vector<3x16x16xf32>
    %cst_18 = arith.constant 1.000000e+00 : f32
    %42 = vector.broadcast %cst_18 : f32 to vector<3x16x16xf32>
    %43 = arith.subf %42, %3 : vector<3x16x16xf32>
    %cst_19 = arith.constant 1.000000e-03 : f32
    %44 = vector.broadcast %cst_19 : f32 to vector<3x16x16xf32>
    %45 = arith.mulf %44, %43 : vector<3x16x16xf32>
    %46 = arith.addf %41, %45 : vector<3x16x16xf32>
    %c0_20 = arith.constant 0 : index
    %c0_21 = arith.constant 0 : index
    %c0_22 = arith.constant 0 : index
    %47 = vector.load %arg3[%c0_20, %c0_21, %c0_22] : memref<1x1x768xf32, #tpu.memory_space<vmem>>, vector<1x1x768xf32>
    %48 = vector.shape_cast %47 : vector<1x1x768xf32> to vector<1x768xf32>
    %c0_23 = arith.constant 0 : index
    %c0_24 = arith.constant 0 : index
    %c0_25 = arith.constant 0 : index
    %49 = vector.load %arg4[%c0_23, %c0_24, %c0_25] : memref<1x1x768xf32, #tpu.memory_space<vmem>>, vector<1x1x768xf32>
    %50 = vector.shape_cast %49 : vector<1x1x768xf32> to vector<1x768xf32>
    %51 = vector.shape_cast %46 : vector<3x16x16xf32> to vector<1x3x16x16xf32>
    %cst_26 = arith.constant dense<0.000000e+00> : vector<1xf32>
    %52 = vector.multi_reduction <add>, %51, %cst_26 [1, 2, 3] : vector<1x3x16x16xf32> to vector<1xf32>
    %53 = vector.shape_cast %52 : vector<1xf32> to vector<1x1x1x1xf32>
    %54 = vector.extract %53[0, 0, 0, 0] : f32 from vector<1x1x1x1xf32>
    %55 = arith.subf %48, %50 : vector<1x768xf32>
    %56 = math.absf %55 : vector<1x768xf32>
    %57 = vector.shape_cast %56 : vector<1x768xf32> to vector<1x1x768xf32>
    %cst_27 = arith.constant dense<0.000000e+00> : vector<1xf32>
    %58 = vector.multi_reduction <add>, %57, %cst_27 [1, 2] : vector<1x1x768xf32> to vector<1xf32>
    %59 = vector.shape_cast %58 : vector<1xf32> to vector<1x1x1xf32>
    %60 = vector.extract %59[0, 0, 0] : f32 from vector<1x1x1xf32>
    %cst_28 = arith.constant 1.000000e-03 : f32
    %61 = arith.mulf %cst_28, %60 : f32
    %62 = arith.addf %54, %61 : f32
    %63 = vector.broadcast %62 : f32 to vector<1x8x128xf32>
    %c0_29 = arith.constant 0 : index
    %c0_30 = arith.constant 0 : index
    %c0_31 = arith.constant 0 : index
    %64 = vector.load %arg5[%c0_29, %c0_30, %c0_31] : memref<1x8x128xf32, #tpu.memory_space<vmem>>, vector<1x8x128xf32>
    tpu.vector_store %arg5[%c0_29, %c0_30, %c0_31], %63 {strides = array<i32>} : memref<1x8x128xf32, #tpu.memory_space<vmem>>, vector<1x8x128xf32>,
    return
  }
  func.func @transform_0(%arg0: i32) -> (i32, i32, i32, i32) {
    %c0_i32 = arith.constant 0 : i32
    %c0_i32_0 = arith.constant 0 : i32
    %c0_i32_1 = arith.constant 0 : i32
    %c0_i32_2 = arith.constant 0 : i32
    return %arg0, %c0_i32, %c0_i32_0, %c0_i32_1 : i32, i32, i32, i32
  }
  func.func @transform_1(%arg0: i32) -> (i32, i32, i32, i32) {
    %c0_i32 = arith.constant 0 : i32
    %c0_i32_0 = arith.constant 0 : i32
    %c0_i32_1 = arith.constant 0 : i32
    %c0_i32_2 = arith.constant 0 : i32
    return %arg0, %c0_i32, %c0_i32_0, %c0_i32_1 : i32, i32, i32, i32
  }
  func.func @transform_2(%arg0: i32) -> (i32, i32, i32) {
    %c0_i32 = arith.constant 0 : i32
    %c0_i32_0 = arith.constant 0 : i32
    %c0_i32_1 = arith.constant 0 : i32
    return %arg0, %c0_i32, %c0_i32_0 : i32, i32, i32
  }
  func.func @transform_3(%arg0: i32) -> (i32, i32, i32) {
    %c0_i32 = arith.constant 0 : i32
    %c0_i32_0 = arith.constant 0 : i32
    %c0_i32_1 = arith.constant 0 : i32
    return %arg0, %c0_i32, %c0_i32_0 : i32, i32, i32
  }
  func.func @transform_4(%arg0: i32) -> (i32, i32, i32) {
    %c0_i32 = arith.constant 0 : i32
    %c0_i32_0 = arith.constant 0 : i32
    %c0_i32_1 = arith.constant 0 : i32
    return %arg0, %c0_i32, %c0_i32_0 : i32, i32, i32
  }
}

</mosaic_0001>

<bundles_post_ra>
// kernel: tpu_custom_call.1
= control target key start
LH: loop header
LB: loop body
LE: loop exit
PB: predicated region body
PF: predicated region fallthrough
CT: control target
= control target key end

     0   :  { %s1374_s0 = inlined_call_operand.hbm [shape: f32[2,3,16,16], index: 0, kind: input, shape index: {}]   ;;  %s1375_s1 = inlined_call_operand.hbm [shape: f32[2,3,16,16], index: 1, kind: input, shape index: {}]   ;;  %s1376_s2 = inlined_call_operand.hbm [shape: f32[2,1,768], index: 2, kind: input, shape index: {}]   ;;  %s1377_s3 = inlined_call_operand.hbm [shape: f32[2,1,768], index: 3, kind: input, shape index: {}]   ;;  %s1378_s4 = inlined_call_operand.hbm [shape: f32[2,8,128], index: 4, kind: output, shape index: {}]  }
   0x1   :  { %1386 = sst [smem:[#allocation18_spill]] %s1374_s0 }
   0x2   :  { %1387 = sst [smem:[#allocation19_spill]] %s1375_s1 }
   0x3   :  { %9 = vsyncpa [#allocation3], 0 }
   0x4   :  { %11 = vsyncpa [#allocation3 + $0x1], 0 }
   0x5   :  { %12 = vsyncpa [#allocation6], 0 }
   0x6   :  { %14 = vsyncpa [#allocation6 + $0x1], 0 }
   0x7   :  { %15 = vsyncpa [#allocation9], 0 }
   0x8   :  { %17 = vsyncpa [#allocation9 + $0x1], 0 }
   0x9   :  { %18 = vsyncpa [#allocation4], 0 }
   0xa   :  { %20 = vsyncpa [#allocation4 + $0x1], 0  ;;  %s1016_s15 = smov 0   ;;  %s1018_s16 = smov 0  }
   0xb   :  { %s1020_s17 = smov 0   ;;  %s1022_s18 = smov 0  }
   0xc LB: > { %1388 = sst [smem:[#allocation15_spill]] %s975_s17  ;;  %s1037_s19 = sadd.s32 4294967295, %s979_s18   ;;  %s979_s18 = sphi %s1022_s18, %s1407_s18   ;;  %s975_s17 = sphi %s1020_s17, %s1409_s17   ;;  %s971_s16 = sphi %s1018_s16, %s1411_s16   ;;  %s967_s15 = sphi %s1016_s15, %s1410_s15  }
   0xd   : > { %s702_s20 = sadd.s32 4294967294, %s979_s18   ;;  %s1041_s21 = sadd.s32 1, %s979_s18  }
   0xe   : > { %1389 = sst [smem:[#allocation16_spill]] %s1041_s21  ;;  %s33_s22 = sadd.s32 1, %s975_s17 }
   0xf   : > { %s30_s23 = ssub.s32 %s979_s18, %s1041_s21  ;;  %p40_p0 = scmp.ne.s32.totalorder %s975_s17, %s971_s16 }
  0x10   : > { %p31_p1 = scmp.eq.s32.totalorder %s30_s23, 0  ;;  %p41_p2 = scmp.eq.s32.totalorder %s979_s18, 0 }
  0x11   : > { %p46_p3 = scmp.ne.s32.totalorder %s971_s16, %s967_s15  ;;  %p47_p4 = scmp.eq.s32.totalorder %s1037_s19, 0 }
  0x12   : > { %s1053_s24 = scalar_select %p31_p1, %s975_s17, %s33_s22  }
  0x13   : > { %p42_p5 = por %p41_p2, %p40_p0  ;;  %p1055_p6 = por %p47_p4, %p46_p3 }
  0x14   : > { %1390 = sst [smem:[#allocation17_spill]] %s1053_s24  ;;  %p148_p7 = scmp.eq.s32.totalorder %s1037_s19, 1 }
  0x15   : > { %s1391_s25 = scalar_select %p1055_p6, 1, 0 }
  0x16   : > { %p154_p8 = scmp.eq.s32.totalorder %s702_s20, 1  ;;  %p756_p10 = scmp.lt.s32.totalorder %s979_s18, 2 }
  0x17   : > { %p1062_p11 = por %p148_p7, %p40_p0  ;;  %s1071_s28 = sand.u32 1, %s975_s17  }
  0x18   : > { %p1066_p12 = por %p154_p8, %p46_p3  ;;  %s716_s29 = smul.u32 768, %s979_s18 }
  0x19   : > { %s1392_s26 = scalar_select %p1062_p11, 1, 0 }
  0x1a   : > { %s1393_s27 = scalar_select %p1066_p12, 1, 0 }
  0x1b   : > { %s715_s30 = smul.u32 48, %s1071_s28  ;;  %p1075_p13 = pnand %p756_p10, %p42_p5 }
  0x1c   : > { %s195_s6 = sand.u32 1, %s979_s18   ;;  %s1395_s1 = sld [smem:[#allocation19_spill]] }
  0x1d   : > { %s199_s10 = scalar_lea.vmem [#allocation5], %s715_s30  ;;  %s1092_s12 = scalar_lea.sflag [#allocation6], %s195_s6 }
  0x1e   : > { %s206_s11 = sshll.u32 %s199_s10, 4  ;;  %p1098_p2 = pneg %p1075_p13  ;;  %s1089_s11 = int_to_ptr.vmem [resolvable:$true] %s206_s11 }
  0x22   : > { %s1085_s9 = scalar_lea.hbm %s1395_s1, %s716_s29  ;;  %s800_s23 = scalar_lea.hbm %s1395_s1, 1536 }
  0x23   : > { %s795_s13 = scalar_lea.hbm %s1085_s9, 768  ;;  %p801_p5 = scmp.lt.s32.totalorder %s1085_s9, %s1395_s1 }
  0x24   : > { %p796_p1 = scmp.ne.s32.totalorder %s1085_s9, %s795_s13  ;;  %p802_p7 = scmp.lt.s32.totalorder %s800_s23, %s795_s13 }
  0x26   : > { %p798_p3 = pnand %p1098_p2, %p796_p1  ;;  %p803_p8 = por %p802_p7, %p801_p5 }
  0x28   : > { %p799_p4 = pneg %p798_p3 }
  0x2a   : > { %p804_p10 = pnand %p803_p8, %p799_p4 }
  0x2c   : > { %807 = shalt.err (!%p804_p10)
}
  0x2d   : > { %s808_s6 = scalar_lea.vmem %s1089_s11, 768  ;;  %s981_s10 = smov [#allocation5]  }
  0x2e   : > { %p809_p9 = scmp.ne.s32.totalorder %s1089_s11, %s808_s6  ;;  %s813_s20 = sshll.u32 %s981_s10, 4  ;;  %s814_s20 = int_to_ptr.vmem [resolvable:$false] %s813_s20 }
  0x2f   : > { %s815_s22 = scalar_lea.vmem %s814_s20, 1536  ;;  %p816_p0 = scmp.lt.s32.totalorder %s1089_s11, %s814_s20 }
  0x30   : > { %p811_p1 = pnand %p809_p9, %p1098_p2  ;;  %p817_p12 = scmp.lt.s32.totalorder %s815_s22, %s808_s6 }
  0x32   : > { %p812_p3 = pneg %p811_p1  ;;  %p818_p11 = por %p817_p12, %p816_p0 }
  0x34   : > { %p819_p6 = pnand %p818_p11, %p812_p3 }
  0x36   : > { %822 = shalt.err (!%p819_p6)
}
  0x37   : > { %s1381_s13 = smov 128   ;;  %s1382_s23 = smov 8  }
  0x38   : > { %745 = dma.hbm_to_vmem [thread:$0]  (!%p1075_p13), %s1085_s9, 768, %s1089_s11, %s1092_s12, %s1381_s13, %s1381_s13, %s1382_s23  }
  0x39   : > { %p252_p9 = scmp.lt.s32.totalorder %s979_s18, 3  ;;  %s1397_s0 = sld [smem:[#allocation18_spill]] }
  0x3a   : > { %p1398_p6 = scmp.ge.s32.totalorder %s979_s18, 1  ;;  %s178_s20 = scalar_lea.vmem [#allocation2], %s715_s30 }
  0x3b   : > { %s185_s22 = sshll.u32 %s178_s20, 4  ;;  %s719_s9 = smul.u32 6, %s1071_s28  ;;  %s1140_s22 = int_to_ptr.vmem [resolvable:$true] %s185_s22 }
  0x3c   : > { %p1134_p11 = pnand %p1398_p6, %p252_p9  ;;  %s175_s11 = scalar_lea.sflag [#allocation3], %s1071_s28 }
  0x3e   : > { %s1399_s10 = scalar_select %p1134_p11, 1, 0 }
  0x3f   : > { %s1130_s6 = scalar_lea.hbm %s1397_s0, %s716_s29  ;;  %s828_s8 = scalar_lea.hbm %s1397_s0, 1536 }
  0x40   : > { %s823_s13 = scalar_lea.hbm %s1130_s6, 768  ;;  %p829_p5 = scmp.lt.s32.totalorder %s1130_s6, %s1397_s0 }
  0x41   : > { %p824_p12 = scmp.ne.s32.totalorder %s1130_s6, %s823_s13  ;;  %p830_p7 = scmp.lt.s32.totalorder %s828_s8, %s823_s13 }
  0x43   : > { %p826_p0 = pnand %p824_p12, %p1098_p2  ;;  %p831_p8 = por %p830_p7, %p829_p5 }
  0x45   : > { %p827_p4 = pneg %p826_p0 }
  0x47   : > { %p832_p10 = pnand %p831_p8, %p827_p4 }
  0x49   : > { %835 = shalt.err (!%p832_p10)
}
  0x4a   : > { %s836_s30 = scalar_lea.vmem %s1140_s22, 768  ;;  %s984_s20 = smov [#allocation2]  }
  0x4b   : > { %p837_p1 = scmp.ne.s32.totalorder %s1140_s22, %s836_s30  ;;  %s841_s29 = sshll.u32 %s984_s20, 4  ;;  %s842_s29 = int_to_ptr.vmem [resolvable:$false] %s841_s29 }
  0x4c   : > { %s843_s7 = scalar_lea.vmem %s842_s29, 1536  ;;  %p844_p6 = scmp.lt.s32.totalorder %s1140_s22, %s842_s29 }
  0x4d   : > { %p839_p3 = pnand %p837_p1, %p1098_p2  ;;  %p845_p12 = scmp.lt.s32.totalorder %s843_s7, %s836_s30 }
  0x4f   : > { %p840_p9 = pneg %p839_p3  ;;  %p846_p0 = por %p845_p12, %p844_p6 }
  0x51   : > { %p847_p11 = pnand %p846_p0, %p840_p9 }
  0x53   : > { %850 = shalt.err (!%p847_p11)
}
  0x54   : > { %s1400_s1 = smov 8   ;;  %s1401_s13 = smov 128  }
  0x55   : > { %742 = dma.hbm_to_vmem [thread:$0]  (!%p1075_p13), %s1130_s6, 768, %s1140_s22, %s175_s11, %s1401_s13, %s1401_s13, %s1400_s1  }
  0x56   : > { %s720_s23 = smul.u32 96, %s979_s18  ;;  %s220_s8 = scalar_lea.vmem [#allocation7], %s719_s9 }
  0x57   : > { %s228_s20 = sshll.u32 %s220_s8, 4  ;;  %s856_s21 = scalar_lea.hbm %s1376_s2, 192  ;;  %s229_s20 = int_to_ptr.vmem [resolvable:$true] %s228_s20 }
  0x58   : > { %s226_s7 = scalar_lea.hbm %s1376_s2, %s720_s23 }
  0x59   : > { %s851_s0 = scalar_lea.hbm %s226_s7, 96  ;;  %p857_p7 = scmp.lt.s32.totalorder %s226_s7, %s1376_s2 }
  0x5a   : > { %p852_p11 = scmp.ne.s32.totalorder %s226_s7, %s851_s0  ;;  %p858_p8 = scmp.lt.s32.totalorder %s856_s21, %s851_s0 }
  0x5c   : > { %p854_p4 = pnand %p852_p11, %p1098_p2  ;;  %p859_p10 = por %p858_p8, %p857_p7 }
  0x5e   : > { %p855_p5 = pneg %p854_p4 }
  0x60   : > { %p860_p1 = pnand %p859_p10, %p855_p5 }
  0x62   : > { %863 = shalt.err (!%p860_p1)
}
  0x63   : > { %s864_s11 = scalar_lea.vmem %s229_s20, 96  ;;  %s985_s1 = smov [#allocation7]  }
  0x64   : > { %p865_p3 = scmp.ne.s32.totalorder %s229_s20, %s864_s11  ;;  %s869_s13 = sshll.u32 %s985_s1, 4  ;;  %s870_s13 = int_to_ptr.vmem [resolvable:$false] %s869_s13 }
  0x65   : > { %s871_s8 = scalar_lea.vmem %s870_s13, 192  ;;  %p872_p12 = scmp.lt.s32.totalorder %s229_s20, %s870_s13 }
  0x66   : > { %p867_p9 = pnand %p865_p3, %p1098_p2  ;;  %p873_p0 = scmp.lt.s32.totalorder %s871_s8, %s864_s11 }
  0x68   : > { %p868_p6 = pneg %p867_p9  ;;  %p874_p11 = por %p873_p0, %p872_p12 }
  0x6a   : > { %p875_p4 = pnand %p874_p11, %p868_p6 }
  0x6c   : > { %878 = shalt.err (!%p875_p4)
}
  0x6d   : > { %748 = dma.hbm_to_vmem [thread:$0]  (!%p1075_p13), %s226_s7, 96, %s229_s20, %s1092_s12  }
  0x6e   : > { %s1193_s21 = scalar_lea.hbm %s1377_s3, %s720_s23  ;;  %s239_s24 = scalar_lea.vmem [#allocation8], %s719_s9 }
  0x6f   : > { %s247_s30 = sshll.u32 %s239_s24, 4  ;;  %s236_s29 = scalar_lea.sflag [#allocation9], %s1071_s28  ;;  %s248_s30 = int_to_ptr.vmem [resolvable:$true] %s247_s30 }
  0x70   : > { %s879_s6 = scalar_lea.hbm %s1193_s21, 96  ;;  %s884_s7 = scalar_lea.hbm %s1377_s3, 192 }
  0x71   : > { %p880_p5 = scmp.ne.s32.totalorder %s1193_s21, %s879_s6  ;;  %p885_p10 = scmp.lt.s32.totalorder %s1193_s21, %s1377_s3 }
  0x72   : > { %p886_p1 = scmp.lt.s32.totalorder %s884_s7, %s879_s6 }
  0x73   : > { %p882_p7 = pnand %p880_p5, %p1098_p2 }
  0x74   : > { %p887_p3 = por %p886_p1, %p885_p10 }
  0x75   : > { %p883_p8 = pneg %p882_p7 }
  0x77   : > { %p888_p9 = pnand %p887_p3, %p883_p8 }
  0x79   : > { %891 = shalt.err (!%p888_p9)
}
  0x7a   : > { %s892_s9 = scalar_lea.vmem %s248_s30, 96  ;;  %s986_s28 = smov [#allocation8]  }
  0x7b   : > { %p893_p6 = scmp.ne.s32.totalorder %s248_s30, %s892_s9  ;;  %s897_s11 = sshll.u32 %s986_s28, 4  ;;  %s898_s11 = int_to_ptr.vmem [resolvable:$false] %s897_s11 }
  0x7c   : > { %s899_s1 = scalar_lea.vmem %s898_s11, 192  ;;  %p900_p11 = scmp.lt.s32.totalorder %s248_s30, %s898_s11 }
  0x7d   : > { %p895_p12 = pnand %p893_p6, %p1098_p2  ;;  %p901_p4 = scmp.lt.s32.totalorder %s899_s1, %s892_s9 }
  0x7f   : > { %p896_p0 = pneg %p895_p12  ;;  %p902_p5 = por %p901_p4, %p900_p11 }
  0x81   : > { %p903_p7 = pnand %p902_p5, %p896_p0 }
  0x83   : > { %906 = shalt.err (!%p903_p7)
}
  0x84   : > { %751 = dma.hbm_to_vmem [thread:$0]  (!%p1075_p13), %s1193_s21, 96, %s248_s30, %s236_s29  }
  0x85   : > { %p1402_p8 = scmp.ne.s32.totalorder %s1399_s10, 0 }
  0x86   : > { %s1217_s14 = sand.u32 (!%p1402_p8), 1, %s971_s16   ;;  %p1403_p2 = scmp.ne.s32.totalorder (!%p1402_p8), %s1391_s25, 0 }
  0x87   : > { %256 = sbr.rel (%p1402_p8) target bundleno = 758 (0x2f6), region = 36  ;;  %s259_s8 = scalar_lea.sflag (!%p1402_p8), [#allocation3], %s1217_s14 }
  0x88   : > { %s723_s13 = smul.u32 (!%p1402_p8), 48, %s1217_s14 }
  0x8a   : > { %s262_s0 = scalar_lea.vmem (!%p1402_p8), [#allocation2], %s723_s13 }
  0x8c   : > { %950 = dma.done.wait (%p1403_p2), %s259_s8, 768  }
  0x8d   : > { %952 = vsyncadd (%p1403_p2), %s259_s8, 4294966528  ;;  %s267_s5 = sand.u32 1, %s1037_s19   ;;  %s271_s10 = scalar_lea.vmem [#allocation5], %s723_s13 }
  0x8e   : > { %s268_s17 = scalar_lea.sflag [#allocation6], %s267_s5 }
  0x8f   : > { %954 = dma.done.wait (%p1403_p2), %s268_s17, 864  }
  0x90   : > { %956 = vsyncadd (%p1403_p2), %s268_s17, 4294966432  ;;  %s724_s21 = smul.u32 6, %s1217_s14  ;;  %s286_s30 = scalar_lea.sflag [#allocation9], %s1217_s14 }
  0x92   : > { %s1231_s24 = scalar_lea.vmem [#allocation7], %s724_s21  ;;  %s1234_s29 = scalar_lea.vmem [#allocation8], %s724_s21 }
  0x93   : > { %958 = dma.done.wait (%p1403_p2), %s286_s30, 96  }
  0x94   : > { %960 = vsyncadd (%p1403_p2), %s286_s30, 4294967200  ;;  %v329_v0 = vld [vmem:[%s262_s0] sm:$0xff]  ;;  %v331_v1 = vld [vmem:[%s262_s0 + $0x10] sm:$0xff]  ;;  %vm347_vm0 = vcmask 130048   ;;  %s987_s25 = smov 16   ;;  %vm364_vm1 = vcmask 1047680   ;;  %v358_v38 = vlaneseq }
  0x95   : > { %v333_v2 = vld [vmem:[%s262_s0 + $0x20] sm:$0xff]  ;;  %v1242_v4 = vld [vmem:[%s271_s10 + $0x10] sm:$0xff]  ;;  %v330_v9 = vld [vmem:[%s262_s0 + $0x8] sm:$0xff]  ;;  %s988_s6 = smov 113   ;;  %s989_s12 = smov 127   ;;  %vm527_vm2 = vcmask 1040384  }
  0x96   : > { %v1240_v3 = vld [vmem:[%s271_s10] sm:$0xff]  ;;  %v1250_v7 = vsub.f32 %v331_v1, %v1242_v4  ;;  %v332_v10 = vld [vmem:[%s262_s0 + $0x18] sm:$0xff]  ;;  %v334_v11 = vld [vmem:[%s262_s0 + $0x28] sm:$0xff]  ;;  %v359_v40 = vshrl.u32 %v358_v38, 7  ;;  %s710_s20 = sshll.u32 %s1217_s14, 3  ;;  %s712_s23 = sshll.u32 %s1037_s19, 7 }
  0x97   : > { %v1244_v5 = vld [vmem:[%s271_s10 + $0x20] sm:$0xff]  ;;  %v1247_v6 = vsub.f32 %v329_v0, %v1240_v3  ;;  %v1255_v12 = vld [vmem:[%s271_s10 + $0x8] sm:$0xff]  ;;  %v1257_v13 = vld [vmem:[%s271_s10 + $0x18] sm:$0xff]  ;;  %s328_s28 = scalar_lea.vmem [#allocation10], %s710_s20  ;;  %s1337_s0 = scalar_lea.hbm %s1378_s4, %s712_s23 }
  0x98   : > { %v1253_v8 = vsub.f32 %v333_v2, %v1244_v5  ;;  %v1259_v14 = vld [vmem:[%s271_s10 + $0x28] sm:$0xff]  ;;  %v349_v16 = vsel %vm347_vm0, %v1250_v7, 0.0  ;;  %v1268_v18 = vsub.f32 %v330_v9, %v1255_v12  ;;  %v1271_v20 = vsub.f32 %v332_v10, %v1257_v13  ;;  %v472_v36 = vld [vmem:[%s1231_s24] sm:$0x3f]  ;;  %s566_s11 = sshll.u32 %s328_s28, 4  ;;  %s553_s5 = scalar_lea.sflag [#allocation4], %s1217_s14  ;;  %s567_s11 = int_to_ptr.vmem [resolvable:$true] %s566_s11 }
  0x99   : > { %v348_v15 = vsel %vm347_vm0, %v1247_v6, 0.0  ;;  %v1274_v21 = vsub.f32 %v334_v11, %v1259_v14  ;;  %v473_v37 = vld [vmem:[%s1234_s29] sm:$0x3f]  ;;  %v499_v42 = vsub.s32 0, %v359_v40  ;;  %v503_v43 = vsub.s32 1, %v359_v40  ;;  %s907_s17 = scalar_lea.vmem %s567_s11, 128 }
  0x9a   : > { %v351_v17 = vsel %vm347_vm0, %v1253_v8, 0.0  ;;  %v350_v19 = vadd.f32 %v349_v16, %v348_v15  ;;  %v353_v22 = vsel %vm347_vm0, %v1268_v18, 0.0  ;;  %v354_v24 = vsel %vm347_vm0, %v1271_v20, 0.0  ;;  %p908_p13 = scmp.ne.s32.totalorder %s567_s11, %s907_s17  ;;  %p1404_p10 = scmp.ne.s32.totalorder %s1392_s26, 0 }
  0x9b   : > { %v356_v25 = vsel %vm347_vm0, %v1274_v21, 0.0  ;;  %v355_v26 = vadd.f32 %v354_v24, %v353_v22  ;;  %v494_v39 = vsub.f32 %v472_v36, %v473_v37  ;;  %v507_v46 = vsub.s32 2, %v359_v40  ;;  %s990_s10 = smov [#allocation10]  }
  0x9c   : > { %v1278_v23 = vadd.f32 %v351_v17, %v350_v19  ;;  %v511_v48 = vsub.s32 3, %v359_v40  ;;  %v515_v53 = vsub.s32 4, %v359_v40  ;;  %v519_v57 = vsub.s32 5, %v359_v40  ;;  %p909_p1 = pnand %p908_p13, %p1404_p10  ;;  %s911_s19 = sshll.u32 %s990_s10, 4  ;;  %s912_s19 = int_to_ptr.vmem [resolvable:$false] %s911_s19 }
  0x9d   : > { %v1285_v27 = vadd.f32 %v356_v25, %v355_v26  ;;  %v495_v41 = vand.u32 2147483647, %v494_v39  ;;  %vm400_vm3 = vcmp.lt.s32.totalorder %v359_v40, 1  ;;  %v362_v9 = vand.u32 127, %v358_v38  ;;  %s913_s21 = scalar_lea.vmem %s912_s19, 256  ;;  %p914_p9 = scmp.lt.s32.totalorder %s567_s11, %s912_s19 }
  0x9e   : > { %365 = vrot.lane.b32.xlu0 %v1278_v23, %s987_s25  ;;  %v398_v2 = vrot.slane %v1278_v23, 7  ;;  %v407_v11 = vrot.slane %v1278_v23, 1  ;;  %vm396_vm4 = vcmp.eq.s32.totalorder %v359_v40, 0  ;;  %vm409_vm5 = vcmp.lt.s32.totalorder %v359_v40, 7  ;;  %p910_p3 = pneg %p909_p1  ;;  %p915_p6 = scmp.lt.s32.totalorder %s913_s21, %s907_s17 }
  0x9f   : > { %v500_v44 = vrot.slane %v495_v41, %v499_v42  ;;  %v504_v45 = vrot.slane %v495_v41, %v503_v43  ;;  %v508_v47 = vrot.slane %v495_v41, %v507_v46  ;;  %v512_v52 = vrot.slane %v495_v41, %v511_v48 }
  0xa0   : > { %v516_v56 = vrot.slane %v495_v41, %v515_v53  ;;  %v520_v60 = vrot.slane %v495_v41, %v519_v57  ;;  %v399_v1 = vrot.slane %v1285_v27, 7  ;;  %v408_v10 = vrot.slane %v1285_v27, 1  ;;  %p916_p12 = por %p915_p6, %p914_p9 }
  0xa1   : > { %v528_v49 = vsel %vm527_vm2, %v500_v44, 0.0  ;;  %v529_v50 = vsel %vm527_vm2, %v504_v45, 0.0  ;;  %v531_v54 = vsel %vm527_vm2, %v508_v47, 0.0  ;;  %v533_v58 = vsel %vm527_vm2, %v512_v52, 0.0 }
  0xa2   : > { %368 = vrot.lane.b32.xlu0 %v1285_v27, %s987_s25  ;;  %v530_v51 = vadd.f32 %v529_v50, %v528_v49  ;;  %v535_v61 = vsel %vm527_vm2, %v516_v56, 0.0  ;;  %v537_v63 = vsel %vm527_vm2, %v520_v60, 0.0  ;;  %v402_v15 = vsel %vm400_vm3, %v399_v1, %v398_v2  ;;  %p917_p0 = pnand %p916_p12, %p910_p3 }
  0xa3   : > { %v360_v16 = vadd.s32 8, %v359_v40  ;;  %v403_v17 = vsel %vm396_vm4, 0.0, %v402_v15  ;;  %v410_v19 = vsel %vm409_vm5, %v407_v11, %v408_v10  ;;  %vm363_vm6 = vcmp.eq.s32.totalorder %v362_v9, 0 }
  0xa4   : > { %v532_v55 = vadd.f32 %v531_v54, %v530_v51  ;;  %v411_v22 = vsel %vm409_vm5, %v408_v10, %v407_v11  ;;  %v414_v25 = vadd.f32 %v410_v19, %v403_v17  ;;  %vm387_vm8 = vcmp.eq.s32.totalorder %v362_v9, 15 }
  0xa5   : > { %vm406_vm7 = vcmp.eq.s32.totalorder %v360_v16, 15  ;;  %v421_v41 = vmul.f32 4.0, %v1285_v27  ;;  %v430_v47 = vand.u32 2147483647, %v1247_v6  ;;  %v454_v48 = vsub.f32 1.0, %v1240_v3 }
  0xa6   : > { %v534_v59 = vadd.f32 %v533_v58, %v532_v55  ;;  %v431_v52 = vand.u32 2147483647, %v1268_v18  ;;  %v434_v53 = vand.u32 2147483647, %v1253_v8  ;;  %v455_v54 = vsub.f32 1.0, %v1255_v12 }
  0xa7   : > { %v458_v58 = vsub.f32 1.0, %v1244_v5  ;;  %v433_v12 = vand.u32 2147483647, %v1271_v20  ;;  %v435_v10 = vand.u32 2147483647, %v1274_v21  ;;  %v459_v11 = vsub.f32 1.0, %v1259_v14 }
  0xa8   : > { %v536_v62 = vadd.f32 %v535_v61, %v534_v59  ;;  %v460_v59 = vmul.f32 0.001, %v454_v48  ;;  %v457_v61 = vsub.f32 1.0, %v1257_v13 }
  0xaa   : > { %v538_v0 = vadd.f32 %v537_v63, %v536_v62  ;;  %v463_v16 = vmul.f32 0.001, %v457_v61 }
 0x110   : > { %v366_v28 = vpop.permute.xlu0 %365 }
 0x111   : > { %v367_v29 = vsel %vm364_vm1, %v366_v28, %v1278_v23  ;;  %v401_v28 = vsel %vm400_vm3, %v398_v2, %v399_v1 }
 0x112   : > { %371 = vrot.lane.b32.xlu1 %v367_v29, %s987_s25  ;;  %v413_v29 = vsel %vm406_vm7, 0.0, %v411_v22  ;;  %v464_v22 = vmul.f32 0.001, %v458_v58 }
 0x114   : > { %v369_v30 = vpop.permute.xlu0 %368 }
 0x115   : > { %v370_v31 = vsel %vm364_vm1, %v369_v30, %v1285_v27 }
 0x116   : > { %373 = vrot.lane.b32.xlu1 %v370_v31, %s987_s25 }
 0x184   : > { %v372_v32 = vpop.permute.xlu1 %371 }
 0x185   : > { %v375_v33 = vsel %vm364_vm1, %v372_v32, %v1278_v23  ;;  %v415_v32 = vadd.f32 %v413_v29, %v401_v28 }
 0x186   : > { %379 = vrot.lane.b32.xlu0 %v375_v33, %s988_s6 }
 0x188   : > { %v374_v34 = vpop.permute.xlu1 %373 }
 0x189   : > { %v376_v35 = vsel %vm364_vm1, %v374_v34, %v1285_v27  ;;  %v420_v34 = vmul.f32 4.0, %v1278_v23  ;;  %v432_v23 = vand.u32 2147483647, %v1250_v7  ;;  %v456_v27 = vsub.f32 1.0, %v1242_v4 }
 0x18a   : > { %388 = vrot.lane.b32.xlu0 %v375_v33, %s989_s12  ;;  %381 = vrot.lane.b32.xlu1 %v376_v35, %s988_s6 }
 0x18b   : > { %v462_v62 = vmul.f32 0.001, %v456_v27 }
 0x18e   : > { %390 = vrot.lane.b32.xlu1 %v376_v35, %s989_s12 }
 0x1b2   : > { %539 = vadd.xlane.f32.xlu1 %v538_v0 }
 0x1f8   : > { %v380_v24 = vpop.permute.xlu0 %379 }
 0x1f9   : > { %v385_v26 = vsel %vm363_vm6, 0.0, %v380_v24 }
 0x1fa   : > { %v416_v30 = vadd.f32 %v414_v25, %v385_v26  ;;  %v465_v26 = vmul.f32 0.001, %v459_v11 }
 0x1fc   : > { %v382_v31 = vpop.permute.xlu1 %381  ;;  %v389_v33 = vpop.permute.xlu0 %388 }
 0x1fd   : > { %v386_v35 = vsel %vm363_vm6, 0.0, %v382_v31  ;;  %v394_v36 = vsel %vm387_vm8, 0.0, %v389_v33 }
 0x1fe   : > { %v418_v37 = vadd.f32 %v416_v30, %v394_v36  ;;  %v417_v38 = vadd.f32 %v415_v32, %v386_v35 }
 0x200   : > { %v422_v39 = vsub.f32 %v418_v37, %v420_v34  ;;  %v391_v42 = vpop.permute.xlu1 %390 }
 0x201   : > { %v395_v43 = vsel %vm387_vm8, 0.0, %v391_v42 }
 0x202   : > { %v424_v40 = vsub.f32 %v1247_v6, %v422_v39  ;;  %v426_v44 = vsub.f32 %v1250_v7, %v422_v39  ;;  %v428_v45 = vsub.f32 %v1253_v8, %v422_v39  ;;  %v419_v46 = vadd.f32 %v417_v38, %v395_v43 }
 0x204   : > { %v436_v49 = vand.u32 2147483647, %v424_v40  ;;  %v438_v50 = vand.u32 2147483647, %v426_v44  ;;  %v423_v51 = vsub.f32 %v419_v46, %v421_v41  ;;  %v440_v55 = vand.u32 2147483647, %v428_v45 }
 0x206   : > { %v442_v56 = vmul.f32 0.01, %v436_v49  ;;  %v444_v57 = vmul.f32 0.01, %v438_v50  ;;  %v425_v6 = vsub.f32 %v1268_v18, %v423_v51  ;;  %v427_v7 = vsub.f32 %v1271_v20, %v423_v51 }
 0x207   : > { %v429_v3 = vsub.f32 %v1274_v21, %v423_v51  ;;  %v446_v0 = vmul.f32 0.01, %v440_v55  ;;  %v461_v18 = vmul.f32 0.001, %v455_v54 }
 0x208   : > { %v448_v60 = vadd.f32 %v442_v56, %v430_v47  ;;  %v437_v4 = vand.u32 2147483647, %v425_v6  ;;  %v439_v8 = vand.u32 2147483647, %v427_v7  ;;  %v450_v1 = vadd.f32 %v444_v57, %v432_v23 }
 0x209   : > { %v441_v63 = vand.u32 2147483647, %v429_v3  ;;  %v452_v13 = vadd.f32 %v446_v0, %v434_v53 }
 0x20a   : > { %v443_v2 = vmul.f32 0.01, %v437_v4  ;;  %v445_v9 = vmul.f32 0.01, %v439_v8  ;;  %v466_v17 = vadd.f32 %v460_v59, %v448_v60  ;;  %v468_v25 = vadd.f32 %v462_v62, %v450_v1 }
 0x20b   : > { %v447_v15 = vmul.f32 0.01, %v441_v63  ;;  %v470_v21 = vadd.f32 %v464_v22, %v452_v13 }
 0x20c   : > { %v449_v5 = vadd.f32 %v443_v2, %v431_v52  ;;  %v451_v19 = vadd.f32 %v445_v9, %v433_v12  ;;  %v474_v29 = vsel %vm347_vm0, %v466_v17, 0.0  ;;  %v477_v14 = vsel %vm347_vm0, %v468_v25, 0.0 }
 0x20d   : > { %v453_v20 = vadd.f32 %v447_v15, %v435_v10  ;;  %v481_v36 = vsel %vm347_vm0, %v470_v21, 0.0 }
 0x20e   : > { %v467_v24 = vadd.f32 %v461_v18, %v449_v5  ;;  %v469_v28 = vadd.f32 %v463_v16, %v451_v19 }
 0x20f   : > { %v471_v33 = vadd.f32 %v465_v26, %v453_v20 }
 0x210   : > { %v475_v30 = vsel %vm347_vm0, %v467_v24, 0.0  ;;  %v479_v34 = vsel %vm347_vm0, %v469_v28, 0.0 }
 0x211   : > { %v476_v31 = vadd.f32 %v475_v30, %v474_v29  ;;  %v483_v38 = vsel %vm347_vm0, %v471_v33, 0.0 }
 0x213   : > { %v478_v32 = vadd.f32 %v477_v14, %v476_v31 }
 0x215   : > { %v480_v35 = vadd.f32 %v479_v34, %v478_v32 }
 0x217   : > { %v482_v37 = vadd.f32 %v481_v36, %v480_v35 }
 0x219   : > { %v484_v39 = vadd.f32 %v483_v38, %v482_v37 }
 0x21b   : > { %485 = vadd.xlane.f32.xlu0 %v484_v39 }
 0x23b   : > { %v540_v41 = vpop.xlane.xlu1 %539 }
 0x23c   : > { %v541_v42 = vrot.slane %v540_v41, 4 }
 0x23e   : > { %v542_v43 = vadd.f32 %v541_v42, %v540_v41 }
 0x240   : > { %v543_v40 = vrot.slane %v542_v43, 2 }
 0x242   : > { %v544_v47 = vadd.f32 %v543_v40, %v542_v43 }
 0x244   : > { %v545_v49 = vrot.slane %v544_v47, 1 }
 0x246   : > { %v546_v27 = vadd.f32 %v545_v49, %v544_v47 }
 0x2a4   : > { %v486_v44 = vpop.xlane.xlu0 %485 }
 0x2a5   : > { %v487_v45 = vrot.slane %v486_v44, 4 }
 0x2a7   : > { %v488_v46 = vadd.f32 %v487_v45, %v486_v44 }
 0x2a9   : > { %v489_v23 = vrot.slane %v488_v46, 2 }
 0x2ab   : > { %v490_v48 = vadd.f32 %v489_v23, %v488_v46 }
 0x2ad   : > { %v491_v50 = vrot.slane %v490_v48, 1 }
 0x2af   : > { %v492_v51 = vadd.f32 %v491_v50, %v490_v48 }
 0x2b1   : > { %725 = vpush %v492_v51 }
 0x2b2   : > { %727 = vpush %v546_v27 }
 0x2e2   : > { %s726_s7 = spop %725 }
 0x2e3   : > { %s728_s22 = spop %727 }
 0x2e4   : > { %s548_s9 = smul.f32 0.001, %s728_s22 }
 0x2e6   : > { %s549_s1 = sadd.f32 %s726_s7, %s548_s9 }
 0x2e8   : > { %v550_v52 = vstv %s549_s1 }
 0x2e9   : > { %551 = vst [vmem:[%s328_s28] sm:$0xff] %v550_v52 }
 0x2ea   : > { %920 = shalt.err (!%p917_p0)
}
 0x2eb   : > { %s921_s24 = scalar_lea.hbm %s1337_s0, 128  ;;  %s925_s29 = scalar_lea.hbm %s1378_s4, 256 }
 0x2ec   : > { %p922_p11 = scmp.ne.s32.totalorder %s1337_s0, %s921_s24  ;;  %p926_p7 = scmp.lt.s32.totalorder %s1337_s0, %s1378_s4 }
 0x2ed   : > { %p927_p8 = scmp.lt.s32.totalorder %s925_s29, %s921_s24 }
 0x2ee   : > { %p923_p4 = pnand %p922_p11, %p1404_p10 }
 0x2ef   : > { %p928_p2 = por %p927_p8, %p926_p7 }
 0x2f0   : > { %p924_p5 = pneg %p923_p4 }
 0x2f2   : > { %p929_p13 = pnand %p928_p2, %p924_p5 }
 0x2f4   : > { %932 = shalt.err (!%p929_p13)
}
 0x2f5   : > { %737 = dma.vmem_to_hbm [thread:$0]  (%p1404_p10), %s567_s11, 128, %s1337_s0, %s553_s5  }
 0x2f6 PF: > { %s578_s12 = sand.u32 1, %s967_s15   ;;  %p1405_p1 = scmp.ne.s32.totalorder %s1393_s27, 0 }
 0x2f7   : > { %p1406_p3 = scmp.ge.s32.totalorder %s979_s18, 2  ;;  %s579_s20 = scalar_lea.sflag [#allocation4], %s578_s12 }
 0x2f9   : > { %p753_p9 = pnand %p1406_p3, %p1405_p1 }
 0x2fb   : > { %p754_p6 = pneg %p753_p9 }
 0x2fd   : > { %962 = dma.done.wait (%p754_p6), %s579_s20, 128  }
 0x2fe   : > { %964 = vsyncadd (%p754_p6), %s579_s20, 4294967168  ;;  %s1407_s18 = sld [smem:[#allocation16_spill]]  ;;  %s1410_s15 = smov %s971_s16 }
 0x2ff   : > { %s1408_s7 = sld [smem:[#allocation15_spill]] }
 0x300   : > { %s1409_s17 = sld [smem:[#allocation17_spill]] }
 0x304   : > { %p23_p12 = scmp.ge.s32.totalorder %s1407_s18, 4  }
 0x305   : > { %s1411_s16 = smov %s1408_s7 }
 0x306   :  { %25 = sbr.rel (!%p23_p12) target bundleno = 12 (0xc), region = 118 }
 0x30b   :  { %584 = vsyncpa [#allocation3], 1 }
 0x30c   :  { %586 = vsyncpa [#allocation3 + $0x1], 1 }
 0x30d   :  { %587 = vsyncpa [#allocation6], 1 }
 0x30e   :  { %589 = vsyncpa [#allocation6 + $0x1], 1 }
 0x30f   :  { %590 = vsyncpa [#allocation9], 1 }
 0x310   :  { %592 = vsyncpa [#allocation9 + $0x1], 1 }
 0x311   :  { %593 = vsyncpa [#allocation4], 1 }
 0x312   :  { %595 = vsyncpa [#allocation4 + $0x1], 1 }

</bundles_post_ra>
